<compile_context>
chip_gen: v6e
topology: v6e:2x2x1
jax: 0.10.0
libtpu: 0.0.40
codegen_flags: <defaults>
</compile_context>

<pallas_src>
import jax
import jax.numpy as jnp
from jax import lax
from jax.experimental import pallas as pl
from jax.experimental.pallas import tpu as pltpu

_LANE = 128
_MAX_TILE_ROWS = 1024  # 1024x128 f32 = 512 KiB per buffer; safe on v5e/v6e/v7x


def _round_up(x, m):
    return (x + m - 1) // m * m


def _to_slab(a):
    """Flatten to a lane-dense (rows, 128) slab with rows a multiple of 8.

    Pads (a full copy) only when the element count is not already a multiple
    of 1024; pad values are irrelevant -- the kernel masks the tail block.
    """
    flat = a.reshape(-1)
    n = int(flat.size)
    rows = _round_up(pl.cdiv(n, _LANE), 8)
    padded = rows * _LANE
    if padded != n:
        flat = jnp.pad(flat, (0, padded - n))
    return flat.reshape(rows, _LANE), n


def _make_kernel(cfg, t_total):
    """cfg: per-pair static tuple (is_ce, block_rows, n_tiles, valid_in_last_block)."""

    def kernel(y1_ref, x1_ref, y2_ref, x2_ref,
               a1_ref, b1_ref, a2_ref, b2_ref, out_ref):
        t = pl.program_id(0)

        @pl.when(t == 0)
        def _init():
            out_ref[...] = jnp.zeros_like(out_ref)

        pair_refs = ((y1_ref, x1_ref), (y2_ref, x2_ref),
                     (a1_ref, b1_ref), (a2_ref, b2_ref))

        for k, ((ra, rb), (is_ce, br, n_tiles, rem)) in enumerate(zip(pair_refs, cfg)):
            full = br * _LANE

            def term(mask=None, ra=ra, rb=rb, is_ce=is_ce):
                a = ra[...].astype(jnp.float32)
                b = rb[...].astype(jnp.float32)
                if is_ce:
                    v = a * jnp.log(b)          # y * log(x)
                else:
                    d = a - b
                    v = d * d
                if mask is not None:
                    # single select zeroes pad garbage (incl. NaN/Inf products)
                    v = jnp.where(mask, v, 0.0)
                return v

            def accumulate(v, k=k, br=br):
                # Fold the (br,128) tile to a single (8,128) vreg, then one
                # read-modify-write of the resident output block.
                out_ref[k, :, :] += v.reshape(br // 8, 8, _LANE).sum(axis=0)

            if rem == full:
                # Every block of this pair (including the last) is fully valid.
                if n_tiles == t_total:
                    accumulate(term())                      # live on every step
                else:
                    @pl.when(t < n_tiles)                   # skip exhausted pair
                    def _(term=term, accumulate=accumulate):
                        accumulate(term())
            else:
                if n_tiles > 1:
                    @pl.when(t < n_tiles - 1)               # interior: no mask
                    def _(term=term, accumulate=accumulate):
                        accumulate(term())

                @pl.when(t == n_tiles - 1)                  # tail: static mask
                def _(term=term, accumulate=accumulate, br=br, rem=rem):
                    rows = lax.broadcasted_iota(jnp.int32, (br, _LANE), 0)
                    lanes = lax.broadcasted_iota(jnp.int32, (br, _LANE), 1)
                    accumulate(term(rows * _LANE + lanes < rem))

    return kernel


def _tl_partials(y1, x1, y2, x2, m1a, m1b, m2a, m2b):
    """f32 vector [sum(y1*log(x1)), sum(y2*log(x2)), sum((m1a-m1b)^2),
    sum((m2a-m2b)^2)] from a single fused pallas_call."""
    pairs = ((y1, x1, True), (y2, x2, True), (m1a, m1b, False), (m2a, m2b, False))

    slabs, counts, rows_list, is_ce_list = [], [], [], []
    for a, b, is_ce in pairs:
        sa, n = _to_slab(a)
        sb, _ = _to_slab(b)
        slabs += [sa, sb]
        counts.append(n)
        rows_list.append(sa.shape[0])
        is_ce_list.append(is_ce)

    # Balanced streaming: pick per-pair block rows so every pair finishes in
    # the same number of grid steps -> uniform DMA demand per step.
    t_total = max(pl.cdiv(r, _MAX_TILE_ROWS) for r in rows_list)
    brs = [min(_round_up(pl.cdiv(r, t_total), 8), r) for r in rows_list]
    tiles = [pl.cdiv(r, br) for r, br in zip(rows_list, brs)]
    cfg = tuple(
        (is_ce, br, tl, n - (tl - 1) * br * _LANE)
        for is_ce, br, tl, n in zip(is_ce_list, brs, tiles, counts)
    )

    in_specs = []
    for br, tl in zip(brs, tiles):
        # Clamp so exhausted pairs revisit their last block: the revisit skips
        # the DMA and the kernel skips the body via pl.when.
        spec = pl.BlockSpec((br, _LANE), lambda t, tl=tl: (jnp.minimum(t, tl - 1), 0))
        in_specs += [spec, spec]

    total_elems = 2 * sum(counts)
    cost = pl.CostEstimate(
        flops=3 * total_elems,
        transcendentals=counts[0] + counts[1],
        bytes_accessed=int(sum(int(s.size) * s.dtype.itemsize for s in slabs)
                           + 4 * 8 * _LANE * 4),
    )

    out = pl.pallas_call(
        _make_kernel(cfg, t_total),
        out_shape=jax.ShapeDtypeStruct((4, 8, _LANE), jnp.float32),
        grid=(t_total,),
        in_specs=in_specs,
        out_specs=pl.BlockSpec((4, 8, _LANE), lambda t: (0, 0, 0)),
        compiler_params=pltpu.CompilerParams(dimension_semantics=("arbitrary",)),
        cost_estimate=cost,
    )(*slabs)

    # Final tiny cross-lane reduce of the four (8,128) accumulators.
    return out.sum(axis=(1, 2))  # shape (4,)


def tl_loss(y1, x1, y2, x2, t1_1, t1_2, t2_1, t2_2, lam=200.0):
    """TL_Loss.forward: CE(y1,x1) + CE(y2,x2) + lam*(MSE(t1_1,t2_1)+MSE(t1_2,t2_2))/2."""
    sums = _tl_partials(y1, x1, y2, x2, t1_1, t2_1, t1_2, t2_2)
    # CE normalizes by H*W only (matches the PyTorch CE_Loss: S = x.shape[2]*x.shape[3]).
    ce1 = -sums[0] / jnp.float32(x1.shape[2] * x1.shape[3])
    ce2 = -sums[1] / jnp.float32(x2.shape[2] * x2.shape[3])
    mse1 = sums[2] / jnp.float32(t1_1.size)
    mse2 = sums[3] / jnp.float32(t1_2.size)
    return ce1 + ce2 + jnp.float32(lam) * (mse1 + mse2) / 2.0


# ---------------- demo ----------------

if __name__ == "__main__":
    key = jax.random.PRNGKey(0)
    ks = jax.random.split(key, 8)

    # CE inputs: NCHW probability-like maps (x strictly positive for log)
    y1 = jax.random.uniform(ks[0], (2, 4, 16, 16), jnp.float32)
    x1 = jax.random.uniform(ks[1], (2, 4, 16, 16), jnp.float32,
                            minval=0.1, maxval=1.0)
    y2 = jax.random.uniform(ks[2], (2, 4, 16, 16), jnp.float32)
    x2 = jax.random.uniform(ks[3], (2, 4, 16, 16), jnp.float32,
                            minval=0.1, maxval=1.0)

    # MSE inputs: intermediate feature maps (mean over all elements)
    t1_1 = jax.random.normal(ks[4], (2, 8, 8, 8), jnp.float32)
    t1_2 = jax.random.normal(ks[5], (2, 8, 8, 8), jnp.float32)
    t2_1 = jax.random.normal(ks[6], (2, 8, 8, 8), jnp.float32)
    t2_2 = jax.random.normal(ks[7], (2, 8, 8, 8), jnp.float32)

    loss = tl_loss(y1, x1, y2, x2, t1_1, t1_2, t2_1, t2_2, lam=200.0)
    loss = jax.block_until_ready(loss)

    # cross-check against a plain-JAX reference (same math as the PyTorch module)
    def ref_ce(y, x):
        return -jnp.sum(jnp.log(x) * y) / (x.shape[2] * x.shape[3])

    def ref_mse(a, b):
        return jnp.mean((a - b) ** 2)

    ref = (ref_ce(y1, x1) + ref_ce(y2, x2)
           + 200.0 * (ref_mse(t1_1, t2_1) + ref_mse(t1_2, t2_2)) / 2.0)

    assert jnp.allclose(loss, ref, rtol=1e-5, atol=1e-5), (loss, ref)
    print("KERNEL_OK")
</pallas_src>

<mosaic_0001>
module attributes {stable_mosaic.version = 11 : i64} {
  func.func @kernel(%arg0: i32, %arg1: memref<16x128xf32, #tpu.memory_space<vmem>>, %arg2: memref<16x128xf32, #tpu.memory_space<vmem>>, %arg3: memref<16x128xf32, #tpu.memory_space<vmem>>, %arg4: memref<16x128xf32, #tpu.memory_space<vmem>>, %arg5: memref<8x128xf32, #tpu.memory_space<vmem>>, %arg6: memref<8x128xf32, #tpu.memory_space<vmem>>, %arg7: memref<8x128xf32, #tpu.memory_space<vmem>>, %arg8: memref<8x128xf32, #tpu.memory_space<vmem>>, %arg9: memref<4x8x128xf32, #tpu.memory_space<vmem>>) attributes {dimension_semantics = [#tpu.dimension_semantics<arbitrary>], iteration_bounds = array<i64: 1>, scalar_prefetch = 0 : i64, scratch_operands = 0 : i64, tpu.core_type = #tpu.core_type<tc>, window_params = [{transform_indices = @transform_0, window_bounds = array<i64: 16, 128>}, {transform_indices = @transform_1, window_bounds = array<i64: 16, 128>}, {transform_indices = @transform_2, window_bounds = array<i64: 16, 128>}, {transform_indices = @transform_3, window_bounds = array<i64: 16, 128>}, {transform_indices = @transform_4, window_bounds = array<i64: 8, 128>}, {transform_indices = @transform_5, window_bounds = array<i64: 8, 128>}, {transform_indices = @transform_6, window_bounds = array<i64: 8, 128>}, {transform_indices = @transform_7, window_bounds = array<i64: 8, 128>}, {pipeline_mode = #tpu.pipeline_mode<synchronous>, transform_indices = @transform_8, window_bounds = array<i64: 4, 8, 128>}]} {
    %c0_i32 = arith.constant 0 : i32
    %0 = arith.cmpi eq, %arg0, %c0_i32 : i32
    %1 = arith.extui %0 : i1 to i32
    %c0_i32_0 = arith.constant 0 : i32
    %2 = arith.cmpi ne, %1, %c0_i32_0 : i32
    scf.if %2 {
      %cst_40 = arith.constant 0.000000e+00 : f32
      %51 = vector.broadcast %cst_40 : f32 to vector<4x8x128xf32>
      %c0_41 = arith.constant 0 : index
      %c0_42 = arith.constant 0 : index
      %c0_43 = arith.constant 0 : index
      %52 = vector.load %arg9[%c0_41, %c0_42, %c0_43] : memref<4x8x128xf32, #tpu.memory_space<vmem>>, vector<4x8x128xf32>
      tpu.vector_store %arg9[%c0_41, %c0_42, %c0_43], %51 {strides = array<i32>} : memref<4x8x128xf32, #tpu.memory_space<vmem>>, vector<4x8x128xf32>,
    } else {
    }
    %c0 = arith.constant 0 : index
    %c0_1 = arith.constant 0 : index
    %3 = vector.load %arg1[%c0, %c0_1] : memref<16x128xf32, #tpu.memory_space<vmem>>, vector<16x128xf32>
    %c0_2 = arith.constant 0 : index
    %c0_3 = arith.constant 0 : index
    %4 = vector.load %arg2[%c0_2, %c0_3] : memref<16x128xf32, #tpu.memory_space<vmem>>, vector<16x128xf32>
    %5 = math.log %4 : vector<16x128xf32>
    %6 = arith.mulf %3, %5 : vector<16x128xf32>
    %c0_4 = arith.constant 0 : index
    %c0_5 = arith.constant 0 : index
    %c0_6 = arith.constant 0 : index
    %7 = vector.load %arg9[%c0_4, %c0_5, %c0_6] : memref<4x8x128xf32, #tpu.memory_space<vmem>>, vector<1x8x128xf32>
    %8 = vector.shape_cast %7 : vector<1x8x128xf32> to vector<8x128xf32>
    %9 = vector.shape_cast %6 : vector<16x128xf32> to vector<2x8x128xf32>
    %cst = arith.constant dense<0.000000e+00> : vector<8x128xf32>
    %10 = vector.multi_reduction <add>, %9, %cst [0] : vector<2x8x128xf32> to vector<8x128xf32>
    %11 = arith.addf %8, %10 : vector<8x128xf32>
    %c0_7 = arith.constant 0 : index
    %c0_8 = arith.constant 0 : index
    %c0_9 = arith.constant 0 : index
    %12 = vector.load %arg9[%c0_7, %c0_8, %c0_9] : memref<4x8x128xf32, #tpu.memory_space<vmem>>, vector<1x8x128xf32>
    %13 = vector.shape_cast %12 : vector<1x8x128xf32> to vector<8x128xf32>
    %14 = vector.shape_cast %11 : vector<8x128xf32> to vector<1x8x128xf32>
    tpu.vector_store %arg9[%c0_7, %c0_8, %c0_9], %14 {strides = array<i32>} : memref<4x8x128xf32, #tpu.memory_space<vmem>>, vector<1x8x128xf32>,
    %c0_10 = arith.constant 0 : index
    %c0_11 = arith.constant 0 : index
    %15 = vector.load %arg3[%c0_10, %c0_11] : memref<16x128xf32, #tpu.memory_space<vmem>>, vector<16x128xf32>
    %c0_12 = arith.constant 0 : index
    %c0_13 = arith.constant 0 : index
    %16 = vector.load %arg4[%c0_12, %c0_13] : memref<16x128xf32, #tpu.memory_space<vmem>>, vector<16x128xf32>
    %17 = math.log %16 : vector<16x128xf32>
    %18 = arith.mulf %15, %17 : vector<16x128xf32>
    %c1 = arith.constant 1 : index
    %c0_14 = arith.constant 0 : index
    %c0_15 = arith.constant 0 : index
    %19 = vector.load %arg9[%c1, %c0_14, %c0_15] : memref<4x8x128xf32, #tpu.memory_space<vmem>>, vector<1x8x128xf32>
    %20 = vector.shape_cast %19 : vector<1x8x128xf32> to vector<8x128xf32>
    %21 = vector.shape_cast %18 : vector<16x128xf32> to vector<2x8x128xf32>
    %cst_16 = arith.constant dense<0.000000e+00> : vector<8x128xf32>
    %22 = vector.multi_reduction <add>, %21, %cst_16 [0] : vector<2x8x128xf32> to vector<8x128xf32>
    %23 = arith.addf %20, %22 : vector<8x128xf32>
    %c1_17 = arith.constant 1 : index
    %c0_18 = arith.constant 0 : index
    %c0_19 = arith.constant 0 : index
    %24 = vector.load %arg9[%c1_17, %c0_18, %c0_19] : memref<4x8x128xf32, #tpu.memory_space<vmem>>, vector<1x8x128xf32>
    %25 = vector.shape_cast %24 : vector<1x8x128xf32> to vector<8x128xf32>
    %26 = vector.shape_cast %23 : vector<8x128xf32> to vector<1x8x128xf32>
    tpu.vector_store %arg9[%c1_17, %c0_18, %c0_19], %26 {strides = array<i32>} : memref<4x8x128xf32, #tpu.memory_space<vmem>>, vector<1x8x128xf32>,
    %c0_20 = arith.constant 0 : index
    %c0_21 = arith.constant 0 : index
    %27 = vector.load %arg5[%c0_20, %c0_21] : memref<8x128xf32, #tpu.memory_space<vmem>>, vector<8x128xf32>
    %c0_22 = arith.constant 0 : index
    %c0_23 = arith.constant 0 : index
    %28 = vector.load %arg6[%c0_22, %c0_23] : memref<8x128xf32, #tpu.memory_space<vmem>>, vector<8x128xf32>
    %29 = arith.subf %27, %28 : vector<8x128xf32>
    %30 = arith.mulf %29, %29 : vector<8x128xf32>
    %c2 = arith.constant 2 : index
    %c0_24 = arith.constant 0 : index
    %c0_25 = arith.constant 0 : index
    %31 = vector.load %arg9[%c2, %c0_24, %c0_25] : memref<4x8x128xf32, #tpu.memory_space<vmem>>, vector<1x8x128xf32>
    %32 = vector.shape_cast %31 : vector<1x8x128xf32> to vector<8x128xf32>
    %33 = vector.shape_cast %30 : vector<8x128xf32> to vector<1x8x128xf32>
    %cst_26 = arith.constant dense<0.000000e+00> : vector<8x128xf32>
    %34 = vector.multi_reduction <add>, %33, %cst_26 [0] : vector<1x8x128xf32> to vector<8x128xf32>
    %35 = arith.addf %32, %34 : vector<8x128xf32>
    %c2_27 = arith.constant 2 : index
    %c0_28 = arith.constant 0 : index
    %c0_29 = arith.constant 0 : index
    %36 = vector.load %arg9[%c2_27, %c0_28, %c0_29] : memref<4x8x128xf32, #tpu.memory_space<vmem>>, vector<1x8x128xf32>
    %37 = vector.shape_cast %36 : vector<1x8x128xf32> to vector<8x128xf32>
    %38 = vector.shape_cast %35 : vector<8x128xf32> to vector<1x8x128xf32>
    tpu.vector_store %arg9[%c2_27, %c0_28, %c0_29], %38 {strides = array<i32>} : memref<4x8x128xf32, #tpu.memory_space<vmem>>, vector<1x8x128xf32>,
    %c0_30 = arith.constant 0 : index
    %c0_31 = arith.constant 0 : index
    %39 = vector.load %arg7[%c0_30, %c0_31] : memref<8x128xf32, #tpu.memory_space<vmem>>, vector<8x128xf32>
    %c0_32 = arith.constant 0 : index
    %c0_33 = arith.constant 0 : index
    %40 = vector.load %arg8[%c0_32, %c0_33] : memref<8x128xf32, #tpu.memory_space<vmem>>, vector<8x128xf32>
    %41 = arith.subf %39, %40 : vector<8x128xf32>
    %42 = arith.mulf %41, %41 : vector<8x128xf32>
    %c3 = arith.constant 3 : index
    %c0_34 = arith.constant 0 : index
    %c0_35 = arith.constant 0 : index
    %43 = vector.load %arg9[%c3, %c0_34, %c0_35] : memref<4x8x128xf32, #tpu.memory_space<vmem>>, vector<1x8x128xf32>
    %44 = vector.shape_cast %43 : vector<1x8x128xf32> to vector<8x128xf32>
    %45 = vector.shape_cast %42 : vector<8x128xf32> to vector<1x8x128xf32>
    %cst_36 = arith.constant dense<0.000000e+00> : vector<8x128xf32>
    %46 = vector.multi_reduction <add>, %45, %cst_36 [0] : vector<1x8x128xf32> to vector<8x128xf32>
    %47 = arith.addf %44, %46 : vector<8x128xf32>
    %c3_37 = arith.constant 3 : index
    %c0_38 = arith.constant 0 : index
    %c0_39 = arith.constant 0 : index
    %48 = vector.load %arg9[%c3_37, %c0_38, %c0_39] : memref<4x8x128xf32, #tpu.memory_space<vmem>>, vector<1x8x128xf32>
    %49 = vector.shape_cast %48 : vector<1x8x128xf32> to vector<8x128xf32>
    %50 = vector.shape_cast %47 : vector<8x128xf32> to vector<1x8x128xf32>
    tpu.vector_store %arg9[%c3_37, %c0_38, %c0_39], %50 {strides = array<i32>} : memref<4x8x128xf32, #tpu.memory_space<vmem>>, vector<1x8x128xf32>,
    return
  }
  func.func @transform_0(%arg0: i32) -> (i32, i32) {
    %c0_i32 = arith.constant 0 : i32
    %0 = arith.minsi %arg0, %c0_i32 : i32
    %c0_i32_0 = arith.constant 0 : i32
    %c0_i32_1 = arith.constant 0 : i32
    return %0, %c0_i32_0 : i32, i32
  }
  func.func @transform_1(%arg0: i32) -> (i32, i32) {
    %c0_i32 = arith.constant 0 : i32
    %0 = arith.minsi %arg0, %c0_i32 : i32
    %c0_i32_0 = arith.constant 0 : i32
    %c0_i32_1 = arith.constant 0 : i32
    return %0, %c0_i32_0 : i32, i32
  }
  func.func @transform_2(%arg0: i32) -> (i32, i32) {
    %c0_i32 = arith.constant 0 : i32
    %0 = arith.minsi %arg0, %c0_i32 : i32
    %c0_i32_0 = arith.constant 0 : i32
    %c0_i32_1 = arith.constant 0 : i32
    return %0, %c0_i32_0 : i32, i32
  }
  func.func @transform_3(%arg0: i32) -> (i32, i32) {
    %c0_i32 = arith.constant 0 : i32
    %0 = arith.minsi %arg0, %c0_i32 : i32
    %c0_i32_0 = arith.constant 0 : i32
    %c0_i32_1 = arith.constant 0 : i32
    return %0, %c0_i32_0 : i32, i32
  }
  func.func @transform_4(%arg0: i32) -> (i32, i32) {
    %c0_i32 = arith.constant 0 : i32
    %0 = arith.minsi %arg0, %c0_i32 : i32
    %c0_i32_0 = arith.constant 0 : i32
    %c0_i32_1 = arith.constant 0 : i32
    return %0, %c0_i32_0 : i32, i32
  }
  func.func @transform_5(%arg0: i32) -> (i32, i32) {
    %c0_i32 = arith.constant 0 : i32
    %0 = arith.minsi %arg0, %c0_i32 : i32
    %c0_i32_0 = arith.constant 0 : i32
    %c0_i32_1 = arith.constant 0 : i32
    return %0, %c0_i32_0 : i32, i32
  }
  func.func @transform_6(%arg0: i32) -> (i32, i32) {
    %c0_i32 = arith.constant 0 : i32
    %0 = arith.minsi %arg0, %c0_i32 : i32
    %c0_i32_0 = arith.constant 0 : i32
    %c0_i32_1 = arith.constant 0 : i32
    return %0, %c0_i32_0 : i32, i32
  }
  func.func @transform_7(%arg0: i32) -> (i32, i32) {
    %c0_i32 = arith.constant 0 : i32
    %0 = arith.minsi %arg0, %c0_i32 : i32
    %c0_i32_0 = arith.constant 0 : i32
    %c0_i32_1 = arith.constant 0 : i32
    return %0, %c0_i32_0 : i32, i32
  }
  func.func @transform_8(%arg0: i32) -> (i32, i32, i32) {
    %c0_i32 = arith.constant 0 : i32
    %c0_i32_0 = arith.constant 0 : i32
    %c0_i32_1 = arith.constant 0 : i32
    %c0_i32_2 = arith.constant 0 : i32
    return %c0_i32, %c0_i32_0, %c0_i32_1 : i32, i32, i32
  }
}

</mosaic_0001>

<bundles_post_ra>
// kernel: tpu_custom_call.1
= control target key start
LH: loop header
LB: loop body
LE: loop exit
PB: predicated region body
PF: predicated region fallthrough
CT: control target
= control target key end

     0   :  { %13 = vsyncpa [#allocation3], 0  ;;  %s480_s0 = inlined_call_operand.hbm [shape: f32[16,128], index: 0, kind: input, shape index: {}]   ;;  %s481_s1 = inlined_call_operand.hbm [shape: f32[16,128], index: 1, kind: input, shape index: {}]   ;;  %s482_s2 = inlined_call_operand.hbm [shape: f32[16,128], index: 2, kind: input, shape index: {}]   ;;  %s483_s3 = inlined_call_operand.hbm [shape: f32[16,128], index: 3, kind: input, shape index: {}]   ;;  %s484_s4 = inlined_call_operand.hbm [shape: f32[8,128], index: 4, kind: input, shape index: {}]   ;;  %s485_s5 = inlined_call_operand.vmem [shape: f32[8,128], index: 5, kind: input, shape index: {}]   ;;  %s486_s6 = inlined_call_operand.hbm [shape: f32[8,128], index: 6, kind: input, shape index: {}]   ;;  %s487_s7 = inlined_call_operand.hbm [shape: f32[8,128], index: 7, kind: input, shape index: {}]   ;;  %s488_s8 = inlined_call_operand.hbm [shape: f32[4,8,128], index: 8, kind: output, shape index: {}]  }
   0x1   :  { %14 = vsyncpa [#allocation6], 0 }
   0x2   :  { %15 = vsyncpa [#allocation9], 0 }
   0x3   :  { %16 = vsyncpa [#allocation12], 0 }
   0x4   :  { %17 = vsyncpa [#allocation4], 0  ;;  %s383_s27 = smov [#allocation5]   ;;  %s384_s29 = smov [#allocation8]  }
   0x5   :  { %s35_s28 = sshll.u32 %s383_s27, 4  ;;  %s59_s30 = sshll.u32 %s384_s29, 4  ;;  %s36_s28 = int_to_ptr.vmem [resolvable:$true] %s35_s28  ;;  %s60_s30 = int_to_ptr.vmem [resolvable:$true] %s59_s30 }
   0x6   :  { %s221_s9 = scalar_lea.vmem %s36_s28, 256  ;;  %p226_p1 = scmp.lt.s32.totalorder %s36_s28, %s36_s28 }
   0x7   :  { %p222_p0 = scmp.ne.s32.totalorder %s36_s28, %s221_s9  ;;  %p227_p2 = scmp.lt.s32.totalorder %s221_s9, %s221_s9 }
   0x9   :  { %p228_p3 = por %p227_p2, %p226_p1 }
   0xb   :  { %p229_p4 = pnand %p228_p3, %p222_p0 }
   0xd   :  { %232 = shalt.err (!%p229_p4)
}
   0xe   :  { %s385_s10 = smov 128   ;;  %s386_s11 = smov 8  }
   0xf   :  { %41 = dma.hbm_to_vmem [thread:$0]  %s481_s1, 256, %s36_s28, [#allocation6], %s385_s10, %s385_s10, %s386_s11  }
  0x10   :  { %s241_s14 = scalar_lea.vmem %s60_s30, 256  ;;  %p246_p6 = scmp.lt.s32.totalorder %s60_s30, %s60_s30 }
  0x11   :  { %p242_p5 = scmp.ne.s32.totalorder %s60_s30, %s241_s14  ;;  %p247_p7 = scmp.lt.s32.totalorder %s241_s14, %s241_s14 }
  0x13   :  { %p248_p8 = por %p247_p7, %p246_p6 }
  0x15   :  { %p249_p9 = pnand %p248_p8, %p242_p5 }
  0x17   :  { %252 = shalt.err (!%p249_p9)
}
  0x18   :  { %65 = dma.hbm_to_vmem [thread:$0]  %s483_s3, 256, %s60_s30, [#allocation9], %s385_s10, %s385_s10, %s386_s11  }
  0x19   :  { %s387_s17 = smov [#allocation11]   ;;  %s388_s19 = smov [#allocation2]  }
  0x1a   :  { %s84_s18 = sshll.u32 %s387_s17, 4  ;;  %s23_s20 = sshll.u32 %s388_s19, 4  ;;  %s85_s18 = int_to_ptr.vmem [resolvable:$true] %s84_s18  ;;  %s24_s20 = int_to_ptr.vmem [resolvable:$true] %s23_s20 }
  0x1b   :  { %s261_s1 = scalar_lea.vmem %s85_s18, 128  ;;  %p266_p11 = scmp.lt.s32.totalorder %s85_s18, %s85_s18 }
  0x1c   :  { %p262_p10 = scmp.ne.s32.totalorder %s85_s18, %s261_s1  ;;  %p267_p12 = scmp.lt.s32.totalorder %s261_s1, %s261_s1 }
  0x1e   :  { %p268_p13 = por %p267_p12, %p266_p11 }
  0x20   :  { %p269_p0 = pnand %p268_p13, %p262_p10 }
  0x22   :  { %272 = shalt.err (!%p269_p0)
}
  0x23   :  { %87 = dma.hbm_to_vmem [thread:$0]  %s486_s6, 128, %s85_s18, [#allocation12]  }
  0x24   :  { %s281_s23 = scalar_lea.vmem %s24_s20, 256  ;;  %p286_p2 = scmp.lt.s32.totalorder %s24_s20, %s24_s20 }
  0x25   :  { %p282_p1 = scmp.ne.s32.totalorder %s24_s20, %s281_s23  ;;  %p287_p3 = scmp.lt.s32.totalorder %s281_s23, %s281_s23 }
  0x27   :  { %p288_p4 = por %p287_p3, %p286_p2 }
  0x29   :  { %p289_p5 = pnand %p288_p4, %p282_p1 }
  0x2b   :  { %292 = shalt.err (!%p289_p5)
}
  0x2c   :  { %29 = dma.hbm_to_vmem [thread:$0]  %s480_s0, 256, %s24_s20, [#allocation3], %s385_s10, %s385_s10, %s386_s11  }
  0x2d   :  { %s389_s25 = smov [#allocation7]   ;;  %s390_s27 = smov [#allocation10]  }
  0x2e   :  { %s47_s26 = sshll.u32 %s389_s25, 4  ;;  %s72_s28 = sshll.u32 %s390_s27, 4  ;;  %s48_s26 = int_to_ptr.vmem [resolvable:$true] %s47_s26  ;;  %s73_s28 = int_to_ptr.vmem [resolvable:$true] %s72_s28 }
  0x2f   :  { %s301_s6 = scalar_lea.vmem %s48_s26, 256  ;;  %p306_p7 = scmp.lt.s32.totalorder %s48_s26, %s48_s26 }
  0x30   :  { %p302_p6 = scmp.ne.s32.totalorder %s48_s26, %s301_s6  ;;  %p307_p8 = scmp.lt.s32.totalorder %s301_s6, %s301_s6 }
  0x32   :  { %p308_p9 = por %p307_p8, %p306_p7 }
  0x34   :  { %p309_p10 = pnand %p308_p9, %p302_p6 }
  0x36   :  { %312 = shalt.err (!%p309_p10)
}
  0x37   :  { %53 = dma.hbm_to_vmem [thread:$0]  %s482_s2, 256, %s48_s26, [#allocation6], %s385_s10, %s385_s10, %s386_s11  }
  0x38   :  { %s321_s0 = scalar_lea.vmem %s73_s28, 128  ;;  %p326_p12 = scmp.lt.s32.totalorder %s73_s28, %s73_s28 }
  0x39   :  { %p322_p11 = scmp.ne.s32.totalorder %s73_s28, %s321_s0  ;;  %p327_p13 = scmp.lt.s32.totalorder %s321_s0, %s321_s0 }
  0x3b   :  { %p328_p0 = por %p327_p13, %p326_p12 }
  0x3d   :  { %p329_p1 = pnand %p328_p0, %p322_p11 }
  0x3f   :  { %332 = shalt.err (!%p329_p1)
}
  0x40   :  { %75 = dma.hbm_to_vmem [thread:$0]  %s484_s4, 128, %s73_s28, [#allocation9]  }
  0x41   :  { %s391_s13 = smov [#allocation13]  }
  0x42   :  { %s94_s14 = sshll.u32 %s391_s13, 4  ;;  %s95_s14 = int_to_ptr.vmem [resolvable:$true] %s94_s14 }
  0x43   :  { %s341_s15 = scalar_lea.vmem %s95_s14, 128  ;;  %p346_p3 = scmp.lt.s32.totalorder %s95_s14, %s95_s14 }
  0x44   :  { %p342_p2 = scmp.ne.s32.totalorder %s95_s14, %s341_s15  ;;  %p347_p4 = scmp.lt.s32.totalorder %s341_s15, %s341_s15 }
  0x46   :  { %p348_p5 = por %p347_p4, %p346_p3 }
  0x48   :  { %p349_p6 = pnand %p348_p5, %p342_p2 }
  0x4a   :  { %352 = shalt.err (!%p349_p6)
}
  0x4b   :  { %97 = dma.hbm_to_vmem [thread:$0]  %s487_s7, 128, %s95_s14, [#allocation12]  }
  0x4c   :  { %373 = dma.done.wait [#allocation3], 256  }
  0x4d   :  { %374 = vsyncadd [#allocation3], 4294967040 }
  0x4e   :  { %375 = dma.done.wait [#allocation6], 512  }
  0x4f   :  { %376 = vsyncadd [#allocation6], 4294966784 }
  0x50   :  { %377 = dma.done.wait [#allocation9], 384  }
  0x51   :  { %378 = vsyncadd [#allocation9], 4294966912 }
  0x52   :  { %379 = dma.done.wait [#allocation12], 256  }
  0x53   :  { %380 = vsyncadd [#allocation12], 4294967040  ;;  %v129_v0 = vld [vmem:[#allocation5] sm:$0xff]  ;;  %v130_v1 = vld [vmem:[#allocation5 + $0x8] sm:$0xff] }
  0x54   :  { %205 = vlog2.f32 %v129_v0  ;;  %v143_v2 = vld [vmem:[#allocation8] sm:$0xff]  ;;  %v144_v3 = vld [vmem:[#allocation8 + $0x8] sm:$0xff]  ;;  %v156_v4 = vld [vmem:[#allocation10] sm:$0xff] }
  0x55   :  { %207 = vlog2.f32 %v130_v1  ;;  %v157_v5 = vld [vmem:[%s485_s5] sm:$0xff]  ;;  %v165_v6 = vld [vmem:[#allocation11] sm:$0xff]  ;;  %v166_v7 = vld [vmem:[#allocation13] sm:$0xff]  ;;  %s392_s5 = smov [#allocation14]  }
  0x56   :  { %209 = vlog2.f32 %v143_v2  ;;  %v158_v8 = vsub.f32 %v156_v4, %v157_v5  ;;  %v167_v9 = vsub.f32 %v165_v6, %v166_v7  ;;  %v127_v13 = vld [vmem:[#allocation2] sm:$0xff]  ;;  %v128_v15 = vld [vmem:[#allocation2 + $0x8] sm:$0xff]  ;;  %s179_s7 = sshll.u32 %s392_s5, 4  ;;  %s180_s7 = int_to_ptr.vmem [resolvable:$true] %s179_s7 }
  0x57   :  { %211 = vlog2.f32 %v144_v3  ;;  %v141_v19 = vld [vmem:[#allocation7] sm:$0xff]  ;;  %v142_v22 = vld [vmem:[#allocation7 + $0x8] sm:$0xff]  ;;  %s353_s18 = scalar_lea.vmem %s180_s7, 512  ;;  %p358_p8 = scmp.lt.s32.totalorder %s180_s7, %s180_s7 }
  0x58   :  { %v159_v10 = vmul.f32 %v158_v8, %v158_v8  ;;  %v168_v11 = vmul.f32 %v167_v9, %v167_v9  ;;  %p354_p7 = scmp.ne.s32.totalorder %s180_s7, %s353_s18  ;;  %p359_p9 = scmp.lt.s32.totalorder %s353_s18, %s353_s18 }
  0x5a   :  { %164 = vst [vmem:[#allocation14 + $0x10] sm:$0xff] %v159_v10  ;;  %173 = vst [vmem:[#allocation14 + $0x18] sm:$0xff] %v168_v11  ;;  %p360_p10 = por %p359_p9, %p358_p8 }
  0x5c   :  { %p361_p11 = pnand %p360_p10, %p354_p7 }
  0x61   :  { %v206_v12 = vpop.eup %205 }
  0x62   :  { %v208_v14 = vpop.eup %207  ;;  %v132_v16 = vmul.f32 0.6931472, %v206_v12 }
  0x63   :  { %v210_v17 = vpop.eup %209  ;;  %v134_v18 = vmul.f32 0.6931472, %v208_v14 }
  0x64   :  { %v212_v20 = vpop.eup %211  ;;  %v135_v21 = vmul.f32 %v132_v16, %v127_v13  ;;  %v146_v23 = vmul.f32 0.6931472, %v210_v17 }
  0x65   :  { %v136_v24 = vmul.f32 %v134_v18, %v128_v15  ;;  %v148_v25 = vmul.f32 0.6931472, %v212_v20 }
  0x66   :  { %v149_v26 = vmul.f32 %v146_v23, %v141_v19 }
  0x67   :  { %v138_v27 = vadd.f32 %v136_v24, %v135_v21  ;;  %v150_v28 = vmul.f32 %v148_v25, %v142_v22 }
  0x69   :  { %v153_v29 = vadd.f32 %v150_v28, %v149_v26  ;;  %140 = vst [vmem:[#allocation14] sm:$0xff] %v138_v27 }
  0x6b   :  { %155 = vst [vmem:[#allocation14 + $0x8] sm:$0xff] %v153_v29 }
  0x6c   :  { %364 = shalt.err (!%p361_p11)
}
  0x6d   :  { %185 = dma.vmem_to_hbm [thread:$0]  %s180_s7, 512, %s488_s8, [#allocation4], %s385_s10, %s385_s10, %s386_s11  }
  0x6e   :  { %381 = dma.done.wait [#allocation4], 512  }
  0x6f   :  { %382 = vsyncadd [#allocation4], 4294966784 }
  0x70   :  { %189 = vsyncpa [#allocation3], 1 }
  0x71   :  { %190 = vsyncpa [#allocation6], 1 }
  0x72   :  { %191 = vsyncpa [#allocation9], 1 }
  0x73   :  { %192 = vsyncpa [#allocation12], 1 }
  0x74   :  { %193 = vsyncpa [#allocation4], 1 }

</bundles_post_ra>
